<compile_context>
chip_gen: v6e
topology: v6e:2x2x1
jax: 0.10.0
libtpu: 0.0.40
codegen_flags: <defaults>
</compile_context>

<pallas_src>
import functools

import jax
import jax.numpy as jnp
from jax.experimental import pallas as pl
from jax.experimental.pallas import tpu as pltpu


def _slot_decoder_kernel(intent_ref, slot_ref, w6_ref, b_in_ref,
                         w_out_ref, b_out_ref, out_ref, *, seq_len):
    # intent_ref / slot_ref / out_ref: (rows, H) VMEM slabs, rows = Bt * L
    # w6_ref: (6, H, H) pre-split dense_in weights; w_out_ref: (H, H)
    rows = intent_ref.shape[0]
    intent = intent_ref[...]                     # (rows, H)
    slot = slot_ref[...]                         # (rows, H)

    # Position of each fused row inside its own length-L sequence; used to
    # zero the rolled rows at sequence starts/ends (no cross-batch leakage).
    pos = jax.lax.broadcasted_iota(jnp.int32, (rows, 1), 0) % seq_len
    not_first = pos != 0                         # valid "previous row" exists
    not_last = pos != (seq_len - 1)              # valid "next row" exists

    def shift_prev(x):                           # h_left[i]  = x[i-1], 0 at seq start
        return jnp.where(not_first, pltpu.roll(x, shift=1, axis=0), 0.0)

    def shift_next(x):                           # h_right[i] = x[i+1], 0 at seq end
        return jnp.where(not_last, pltpu.roll(x, shift=rows - 1, axis=0), 0.0)

    intent_p = shift_prev(intent)
    slot_p = shift_prev(slot)
    intent_n = shift_next(intent)
    slot_n = shift_next(slot)

    # dense_in as six per-source (H, H) matmuls accumulated in f32 — this
    # replaces the lane-axis concatenation of [cat, h_left, h_right].
    h = jnp.dot(intent, w6_ref[0], preferred_element_type=jnp.float32)
    h = h + jnp.dot(slot, w6_ref[1], preferred_element_type=jnp.float32)
    h = h + jnp.dot(intent_p, w6_ref[2], preferred_element_type=jnp.float32)
    h = h + jnp.dot(slot_p, w6_ref[3], preferred_element_type=jnp.float32)
    h = h + jnp.dot(intent_n, w6_ref[4], preferred_element_type=jnp.float32)
    h = h + jnp.dot(slot_n, w6_ref[5], preferred_element_type=jnp.float32)
    h = jnp.maximum(h + b_in_ref[...], 0.0)      # bias broadcast + ReLU

    y = jnp.dot(h, w_out_ref[...], preferred_element_type=jnp.float32)
    y = y + b_out_ref[...]

    # TODO(synk): training-mode dropout omitted (eval mode => identity).
    out_ref[...] = (y + slot).astype(out_ref.dtype)


def prepare_params(params):
    """One-time weight prep (hoisted out of the per-call wrapper):
    transpose + split dense_in into six (H, H) source slices, reshape biases."""
    H = params["b_in"].shape[0]
    w6 = params["w_in"].T.reshape(6, H, H)       # slices multiply, in order:
    # [intent, slot, intent_prev, slot_prev, intent_next, slot_next]
    return (w6,
            params["b_in"].reshape(1, H),
            params["w_out"].T,                   # (H, H)
            params["b_out"].reshape(1, H))


def slot_decoder_block(intent_tensor, slot_tensor, prepared, num_row_blocks=None):
    """intent_tensor, slot_tensor: (B, L, H) float32. prepared = prepare_params(...)."""
    B, L, H = intent_tensor.shape
    w6, b_in, w_out_t, b_out = prepared

    # Fold batch into the matmul M dimension.
    x_int = intent_tensor.reshape(B * L, H)
    x_slot = slot_tensor.reshape(B * L, H)

    # Split the fused rows into (at most) 2 whole-batch row blocks so both of
    # v7x's TensorCores get work; fall back to a single block otherwise.
    if num_row_blocks is None:
        num_row_blocks = 2 if (B % 2 == 0 and ((B // 2) * L) % 8 == 0) else 1
    bt = B // num_row_blocks                     # batch elements per grid step
    rows = bt * L                                # rows per grid step

    kernel = functools.partial(_slot_decoder_kernel, seq_len=L)

    out2d = pl.pallas_call(
        kernel,
        out_shape=jax.ShapeDtypeStruct((B * L, H), jnp.float32),
        grid_spec=pltpu.PrefetchScalarGridSpec(
            num_scalar_prefetch=0,
            grid=(num_row_blocks,),
            in_specs=[
                pl.BlockSpec((rows, H), lambda i: (i, 0)),       # intent rows
                pl.BlockSpec((rows, H), lambda i: (i, 0)),       # slot rows
                pl.BlockSpec((6, H, H), lambda i: (0, 0, 0)),    # split W_in^T
                pl.BlockSpec((1, H), lambda i: (0, 0)),          # b_in
                pl.BlockSpec((H, H), lambda i: (0, 0)),          # W_out^T
                pl.BlockSpec((1, H), lambda i: (0, 0)),          # b_out
            ],
            out_specs=pl.BlockSpec((rows, H), lambda i: (i, 0)),
        ),
        compiler_params=pltpu.CompilerParams(
            dimension_semantics=("parallel",)),
    )(x_int, x_slot, w6, b_in, w_out_t, b_out)

    return out2d.reshape(B, L, H)


def init_params(key, hidden_size):
    """Deterministic init matching nn.Linear(6H, H) / nn.Linear(H, H).
    PyTorch default: U(-1/sqrt(fan_in), 1/sqrt(fan_in))."""
    k1, k2, k3, k4 = jax.random.split(key, 4)
    bound1 = 1.0 / ((6 * hidden_size) ** 0.5)
    bound2 = 1.0 / (hidden_size ** 0.5)
    return {
        # stored as (out_features, in_features), like torch
        "w_in": jax.random.uniform(k1, (hidden_size, 6 * hidden_size),
                                   jnp.float32, -bound1, bound1),
        "b_in": jax.random.uniform(k2, (hidden_size,),
                                   jnp.float32, -bound1, bound1),
        "w_out": jax.random.uniform(k3, (hidden_size, hidden_size),
                                    jnp.float32, -bound2, bound2),
        "b_out": jax.random.uniform(k4, (hidden_size,),
                                    jnp.float32, -bound2, bound2),
    }


def reference(intent_tensor, slot_tensor, params):
    """Pure-JAX reference for correctness checking (mirrors the torch module)."""
    cat = jnp.concatenate([intent_tensor, slot_tensor], axis=2)
    B, L, H2 = cat.shape
    pad = jnp.zeros((B, 1, H2), cat.dtype)
    h_left = jnp.concatenate([pad, cat[:, :L - 1, :]], axis=1)
    h_right = jnp.concatenate([cat[:, 1:, :], pad], axis=1)
    x6 = jnp.concatenate([cat, h_left, h_right], axis=2)
    h = jnp.maximum(x6 @ params["w_in"].T + params["b_in"], 0.0)
    y = h @ params["w_out"].T + params["b_out"]
    return y + slot_tensor


if __name__ == "__main__":
    B, L, H = 2, 8, 32
    key = jax.random.PRNGKey(0)
    k_int, k_slot, k_par = jax.random.split(key, 3)

    intent = jax.random.normal(k_int, (B, L, H), jnp.float32)
    slot = jax.random.normal(k_slot, (B, L, H), jnp.float32)
    params = init_params(k_par, H)
    prepared = prepare_params(params)            # hoisted, done once

    run = jax.jit(slot_decoder_block)
    out = jax.block_until_ready(run(intent, slot, prepared))

    ref = reference(intent, slot, params)
    assert out.shape == (B, L, H)
    # slightly looser tolerance: six partial-sum matmuls reorder the f32 adds
    assert jnp.allclose(out, ref, atol=1e-4, rtol=1e-4), "mismatch vs reference"

    print("KERNEL_OK")
</pallas_src>

<mosaic_0001>
module attributes {stable_mosaic.version = 11 : i64} {
  func.func @_slot_decoder_kernel(%arg0: i32, %arg1: memref<8x32xf32, #tpu.memory_space<vmem>>, %arg2: memref<8x32xf32, #tpu.memory_space<vmem>>, %arg3: memref<6x32x32xf32, #tpu.memory_space<vmem>>, %arg4: memref<1x32xf32, #tpu.memory_space<vmem>>, %arg5: memref<32x32xf32, #tpu.memory_space<vmem>>, %arg6: memref<1x32xf32, #tpu.memory_space<vmem>>, %arg7: memref<8x32xf32, #tpu.memory_space<vmem>>) attributes {dimension_semantics = [#tpu.dimension_semantics<parallel>], iteration_bounds = array<i64: 2>, scalar_prefetch = 0 : i64, scratch_operands = 0 : i64, tpu.core_type = #tpu.core_type<tc>, window_params = [{transform_indices = @transform_0, window_bounds = array<i64: 8, 32>}, {transform_indices = @transform_1, window_bounds = array<i64: 8, 32>}, {pipeline_mode = #tpu.pipeline_mode<synchronous>, transform_indices = @transform_2, window_bounds = array<i64: 6, 32, 32>}, {pipeline_mode = #tpu.pipeline_mode<synchronous>, transform_indices = @transform_3, window_bounds = array<i64: 1, 32>}, {pipeline_mode = #tpu.pipeline_mode<synchronous>, transform_indices = @transform_4, window_bounds = array<i64: 32, 32>}, {pipeline_mode = #tpu.pipeline_mode<synchronous>, transform_indices = @transform_5, window_bounds = array<i64: 1, 32>}, {transform_indices = @transform_6, window_bounds = array<i64: 8, 32>}]} {
    %c0 = arith.constant 0 : index
    %c0_0 = arith.constant 0 : index
    %0 = vector.load %arg1[%c0, %c0_0] : memref<8x32xf32, #tpu.memory_space<vmem>>, vector<8x32xf32>
    %c0_1 = arith.constant 0 : index
    %c0_2 = arith.constant 0 : index
    %1 = vector.load %arg2[%c0_1, %c0_2] : memref<8x32xf32, #tpu.memory_space<vmem>>, vector<8x32xf32>
    %2 = tpu.iota {dimensions = array<i32: 0>} : vector<8x1xi32>
    %c8_i32 = arith.constant 8 : i32
    %c0_i32 = arith.constant 0 : i32
    %3 = arith.cmpi eq, %c8_i32, %c0_i32 : i32
    %c1_i32 = arith.constant 1 : i32
    %4 = arith.select %3, %c1_i32, %c8_i32 : i32
    %5 = vector.broadcast %4 : i32 to vector<8x1xi32>
    %6 = arith.remsi %2, %5 : vector<8x1xi32>
    %c0_i32_3 = arith.constant 0 : i32
    %7 = vector.broadcast %c0_i32_3 : i32 to vector<8x1xi32>
    %8 = arith.cmpi ne, %6, %7 : vector<8x1xi32>
    %c0_i32_4 = arith.constant 0 : i32
    %9 = vector.broadcast %c0_i32_4 : i32 to vector<8x1xi32>
    %10 = arith.cmpi slt, %6, %9 : vector<8x1xi32>
    %c0_i32_5 = arith.constant 0 : i32
    %11 = arith.cmpi slt, %4, %c0_i32_5 : i32
    %12 = vector.broadcast %11 : i1 to vector<8x1xi1>
    %13 = vector.broadcast %12 : vector<8x1xi1> to vector<8x1xi1>
    %14 = arith.xori %10, %13 : vector<8x1xi1>
    %15 = arith.andi %14, %8 : vector<8x1xi1>
    %16 = vector.broadcast %4 : i32 to vector<8x1xi32>
    %17 = arith.addi %6, %16 : vector<8x1xi32>
    %18 = arith.select %15, %17, %6 : vector<8x1xi1>, vector<8x1xi32>
    %c0_i32_6 = arith.constant 0 : i32
    %19 = vector.broadcast %c0_i32_6 : i32 to vector<8x1xi32>
    %20 = arith.cmpi ne, %18, %19 : vector<8x1xi32>
    %c7_i32 = arith.constant 7 : i32
    %21 = vector.broadcast %c7_i32 : i32 to vector<8x1xi32>
    %22 = arith.cmpi ne, %18, %21 : vector<8x1xi32>
    %c1_i32_7 = arith.constant 1 : i32
    %23 = tpu.dynamic_rotate %0 by %c1_i32_7 dim 0 : vector<8x32xf32>, i32 -> vector<8x32xf32>
    %cst = arith.constant 0.000000e+00 : f32
    %24 = vector.shape_cast %20 : vector<8x1xi1> to vector<8x1xi1>
    %25 = vector.broadcast %24 : vector<8x1xi1> to vector<8x32xi1>
    %26 = vector.broadcast %cst : f32 to vector<8x32xf32>
    %27 = arith.select %25, %23, %26 : vector<8x32xi1>, vector<8x32xf32>
    %c1_i32_8 = arith.constant 1 : i32
    %28 = tpu.dynamic_rotate %1 by %c1_i32_8 dim 0 : vector<8x32xf32>, i32 -> vector<8x32xf32>
    %cst_9 = arith.constant 0.000000e+00 : f32
    %29 = vector.shape_cast %20 : vector<8x1xi1> to vector<8x1xi1>
    %30 = vector.broadcast %29 : vector<8x1xi1> to vector<8x32xi1>
    %31 = vector.broadcast %cst_9 : f32 to vector<8x32xf32>
    %32 = arith.select %30, %28, %31 : vector<8x32xi1>, vector<8x32xf32>
    %c7_i32_10 = arith.constant 7 : i32
    %33 = tpu.dynamic_rotate %0 by %c7_i32_10 dim 0 : vector<8x32xf32>, i32 -> vector<8x32xf32>
    %cst_11 = arith.constant 0.000000e+00 : f32
    %34 = vector.shape_cast %22 : vector<8x1xi1> to vector<8x1xi1>
    %35 = vector.broadcast %34 : vector<8x1xi1> to vector<8x32xi1>
    %36 = vector.broadcast %cst_11 : f32 to vector<8x32xf32>
    %37 = arith.select %35, %33, %36 : vector<8x32xi1>, vector<8x32xf32>
    %c7_i32_12 = arith.constant 7 : i32
    %38 = tpu.dynamic_rotate %1 by %c7_i32_12 dim 0 : vector<8x32xf32>, i32 -> vector<8x32xf32>
    %cst_13 = arith.constant 0.000000e+00 : f32
    %39 = vector.shape_cast %22 : vector<8x1xi1> to vector<8x1xi1>
    %40 = vector.broadcast %39 : vector<8x1xi1> to vector<8x32xi1>
    %41 = vector.broadcast %cst_13 : f32 to vector<8x32xf32>
    %42 = arith.select %40, %38, %41 : vector<8x32xi1>, vector<8x32xf32>
    %c0_14 = arith.constant 0 : index
    %c0_15 = arith.constant 0 : index
    %c0_16 = arith.constant 0 : index
    %43 = vector.load %arg3[%c0_14, %c0_15, %c0_16] : memref<6x32x32xf32, #tpu.memory_space<vmem>>, vector<1x32x32xf32>
    %44 = vector.shape_cast %43 : vector<1x32x32xf32> to vector<32x32xf32>
    %cst_17 = arith.constant dense<0.000000e+00> : vector<8x32xf32>
    %45 = tpu.matmul %0, %44, %cst_17 {dimension_numbers = #tpu.dot_dimension_numbers<[1], [0], [0], [1], [0, 0, 1, 1], [], []>} : vector<8x32xf32>, vector<32x32xf32>, vector<8x32xf32> -> vector<8x32xf32>
    %c1 = arith.constant 1 : index
    %c0_18 = arith.constant 0 : index
    %c0_19 = arith.constant 0 : index
    %46 = vector.load %arg3[%c1, %c0_18, %c0_19] : memref<6x32x32xf32, #tpu.memory_space<vmem>>, vector<1x32x32xf32>
    %47 = vector.shape_cast %46 : vector<1x32x32xf32> to vector<32x32xf32>
    %cst_20 = arith.constant dense<0.000000e+00> : vector<8x32xf32>
    %48 = tpu.matmul %1, %47, %cst_20 {dimension_numbers = #tpu.dot_dimension_numbers<[1], [0], [0], [1], [0, 0, 1, 1], [], []>} : vector<8x32xf32>, vector<32x32xf32>, vector<8x32xf32> -> vector<8x32xf32>
    %49 = arith.addf %45, %48 : vector<8x32xf32>
    %c2 = arith.constant 2 : index
    %c0_21 = arith.constant 0 : index
    %c0_22 = arith.constant 0 : index
    %50 = vector.load %arg3[%c2, %c0_21, %c0_22] : memref<6x32x32xf32, #tpu.memory_space<vmem>>, vector<1x32x32xf32>
    %51 = vector.shape_cast %50 : vector<1x32x32xf32> to vector<32x32xf32>
    %cst_23 = arith.constant dense<0.000000e+00> : vector<8x32xf32>
    %52 = tpu.matmul %27, %51, %cst_23 {dimension_numbers = #tpu.dot_dimension_numbers<[1], [0], [0], [1], [0, 0, 1, 1], [], []>} : vector<8x32xf32>, vector<32x32xf32>, vector<8x32xf32> -> vector<8x32xf32>
    %53 = arith.addf %49, %52 : vector<8x32xf32>
    %c3 = arith.constant 3 : index
    %c0_24 = arith.constant 0 : index
    %c0_25 = arith.constant 0 : index
    %54 = vector.load %arg3[%c3, %c0_24, %c0_25] : memref<6x32x32xf32, #tpu.memory_space<vmem>>, vector<1x32x32xf32>
    %55 = vector.shape_cast %54 : vector<1x32x32xf32> to vector<32x32xf32>
    %cst_26 = arith.constant dense<0.000000e+00> : vector<8x32xf32>
    %56 = tpu.matmul %32, %55, %cst_26 {dimension_numbers = #tpu.dot_dimension_numbers<[1], [0], [0], [1], [0, 0, 1, 1], [], []>} : vector<8x32xf32>, vector<32x32xf32>, vector<8x32xf32> -> vector<8x32xf32>
    %57 = arith.addf %53, %56 : vector<8x32xf32>
    %c4 = arith.constant 4 : index
    %c0_27 = arith.constant 0 : index
    %c0_28 = arith.constant 0 : index
    %58 = vector.load %arg3[%c4, %c0_27, %c0_28] : memref<6x32x32xf32, #tpu.memory_space<vmem>>, vector<1x32x32xf32>
    %59 = vector.shape_cast %58 : vector<1x32x32xf32> to vector<32x32xf32>
    %cst_29 = arith.constant dense<0.000000e+00> : vector<8x32xf32>
    %60 = tpu.matmul %37, %59, %cst_29 {dimension_numbers = #tpu.dot_dimension_numbers<[1], [0], [0], [1], [0, 0, 1, 1], [], []>} : vector<8x32xf32>, vector<32x32xf32>, vector<8x32xf32> -> vector<8x32xf32>
    %61 = arith.addf %57, %60 : vector<8x32xf32>
    %c5 = arith.constant 5 : index
    %c0_30 = arith.constant 0 : index
    %c0_31 = arith.constant 0 : index
    %62 = vector.load %arg3[%c5, %c0_30, %c0_31] : memref<6x32x32xf32, #tpu.memory_space<vmem>>, vector<1x32x32xf32>
    %63 = vector.shape_cast %62 : vector<1x32x32xf32> to vector<32x32xf32>
    %cst_32 = arith.constant dense<0.000000e+00> : vector<8x32xf32>
    %64 = tpu.matmul %42, %63, %cst_32 {dimension_numbers = #tpu.dot_dimension_numbers<[1], [0], [0], [1], [0, 0, 1, 1], [], []>} : vector<8x32xf32>, vector<32x32xf32>, vector<8x32xf32> -> vector<8x32xf32>
    %65 = arith.addf %61, %64 : vector<8x32xf32>
    %c0_33 = arith.constant 0 : index
    %c0_34 = arith.constant 0 : index
    %66 = vector.load %arg4[%c0_33, %c0_34] : memref<1x32xf32, #tpu.memory_space<vmem>>, vector<1x32xf32>
    %67 = vector.broadcast %66 : vector<1x32xf32> to vector<8x32xf32>
    %68 = arith.addf %65, %67 : vector<8x32xf32>
    %cst_35 = arith.constant 0.000000e+00 : f32
    %69 = vector.broadcast %cst_35 : f32 to vector<8x32xf32>
    %70 = arith.maximumf %68, %69 : vector<8x32xf32>
    %c0_36 = arith.constant 0 : index
    %c0_37 = arith.constant 0 : index
    %71 = vector.load %arg5[%c0_36, %c0_37] : memref<32x32xf32, #tpu.memory_space<vmem>>, vector<32x32xf32>
    %cst_38 = arith.constant dense<0.000000e+00> : vector<8x32xf32>
    %72 = tpu.matmul %70, %71, %cst_38 {dimension_numbers = #tpu.dot_dimension_numbers<[1], [0], [0], [1], [0, 0, 1, 1], [], []>} : vector<8x32xf32>, vector<32x32xf32>, vector<8x32xf32> -> vector<8x32xf32>
    %c0_39 = arith.constant 0 : index
    %c0_40 = arith.constant 0 : index
    %73 = vector.load %arg6[%c0_39, %c0_40] : memref<1x32xf32, #tpu.memory_space<vmem>>, vector<1x32xf32>
    %74 = vector.broadcast %73 : vector<1x32xf32> to vector<8x32xf32>
    %75 = arith.addf %72, %74 : vector<8x32xf32>
    %76 = arith.addf %75, %1 : vector<8x32xf32>
    %c0_41 = arith.constant 0 : index
    %c0_42 = arith.constant 0 : index
    %77 = vector.load %arg7[%c0_41, %c0_42] : memref<8x32xf32, #tpu.memory_space<vmem>>, vector<8x32xf32>
    tpu.vector_store %arg7[%c0_41, %c0_42], %76 {strides = array<i32>} : memref<8x32xf32, #tpu.memory_space<vmem>>, vector<8x32xf32>,
    return
  }
  func.func @transform_0(%arg0: i32) -> (i32, i32) {
    %c0_i32 = arith.constant 0 : i32
    %c0_i32_0 = arith.constant 0 : i32
    return %arg0, %c0_i32 : i32, i32
  }
  func.func @transform_1(%arg0: i32) -> (i32, i32) {
    %c0_i32 = arith.constant 0 : i32
    %c0_i32_0 = arith.constant 0 : i32
    return %arg0, %c0_i32 : i32, i32
  }
  func.func @transform_2(%arg0: i32) -> (i32, i32, i32) {
    %c0_i32 = arith.constant 0 : i32
    %c0_i32_0 = arith.constant 0 : i32
    %c0_i32_1 = arith.constant 0 : i32
    %c0_i32_2 = arith.constant 0 : i32
    return %c0_i32, %c0_i32_0, %c0_i32_1 : i32, i32, i32
  }
  func.func @transform_3(%arg0: i32) -> (i32, i32) {
    %c0_i32 = arith.constant 0 : i32
    %c0_i32_0 = arith.constant 0 : i32
    %c0_i32_1 = arith.constant 0 : i32
    return %c0_i32, %c0_i32_0 : i32, i32
  }
  func.func @transform_4(%arg0: i32) -> (i32, i32) {
    %c0_i32 = arith.constant 0 : i32
    %c0_i32_0 = arith.constant 0 : i32
    %c0_i32_1 = arith.constant 0 : i32
    return %c0_i32, %c0_i32_0 : i32, i32
  }
  func.func @transform_5(%arg0: i32) -> (i32, i32) {
    %c0_i32 = arith.constant 0 : i32
    %c0_i32_0 = arith.constant 0 : i32
    %c0_i32_1 = arith.constant 0 : i32
    return %c0_i32, %c0_i32_0 : i32, i32
  }
  func.func @transform_6(%arg0: i32) -> (i32, i32) {
    %c0_i32 = arith.constant 0 : i32
    %c0_i32_0 = arith.constant 0 : i32
    return %arg0, %c0_i32 : i32, i32
  }
}

</mosaic_0001>

<bundles_post_ra>
// kernel: slot_decoder_block.1
= control target key start
LH: loop header
LB: loop body
LE: loop exit
PB: predicated region body
PF: predicated region fallthrough
CT: control target
= control target key end

     0   :  { %s1797_s0 = inlined_call_operand.hbm [shape: f32[16,32], index: 0, kind: input, shape index: {}]   ;;  %s1798_s1 = inlined_call_operand.hbm [shape: f32[16,32], index: 1, kind: input, shape index: {}]   ;;  %s1799_s2 = inlined_call_operand.hbm [shape: f32[6,32,32], index: 2, kind: input, shape index: {}]   ;;  %s1800_s3 = inlined_call_operand.vmem [shape: f32[1,32], index: 3, kind: input, shape index: {}]   ;;  %s1801_s4 = inlined_call_operand.hbm [shape: f32[32,32], index: 4, kind: input, shape index: {}]   ;;  %s1802_s5 = inlined_call_operand.vmem [shape: f32[1,32], index: 5, kind: input, shape index: {}]   ;;  %s1803_s6 = inlined_call_operand.hbm [shape: f32[16,32], index: 6, kind: output, shape index: {}]  }
   0x1   :  { %1808 = sst [smem:[#allocation17_spill]] %s1799_s2 }
   0x2   :  { %1809 = sst [smem:[#allocation18_spill]] %s1801_s4 }
   0x3   :  { %11 = vsyncpa [#allocation3], 0 }
   0x4   :  { %13 = vsyncpa [#allocation3 + $0x1], 0 }
   0x5   :  { %14 = vsyncpa [#allocation6], 0 }
   0x6   :  { %16 = vsyncpa [#allocation6 + $0x1], 0 }
   0x7   :  { %17 = vsyncpa [#allocation9], 0 }
   0x8   :  { %18 = vsyncpa [#allocation4], 0 }
   0x9   :  { %20 = vsyncpa [#allocation4 + $0x1], 0  ;;  %s1502_s21 = smov 0   ;;  %s1504_s22 = smov 0  }
   0xa   :  { %s1506_s23 = smov 0   ;;  %s1508_s24 = smov 0  }
   0xb LB: > { %s1523_s25 = sadd.s32 4294967295, %s1456_s24   ;;  %s1056_s26 = sadd.s32 4294967294, %s1456_s24   ;;  %s1456_s24 = sphi %s1508_s24, %s1833_s24   ;;  %s1452_s23 = sphi %s1506_s23, %s1832_s23   ;;  %s1448_s22 = sphi %s1504_s22, %s1831_s22   ;;  %s1444_s21 = sphi %s1502_s21, %s1830_s21  }
   0xc   : > { %p46_p0 = scmp.ne.s32.totalorder %s1448_s22, %s1444_s21  ;;  %p1804_p1 = scmp.eq.s32.totalorder %s1523_s25, 0 }
   0xd   : > { %p186_p3 = scmp.eq.s32.totalorder %s1056_s26, 1  ;;  %p1057_p5 = scmp.ge.s32.totalorder %s1456_s24, 1 }
   0xe   : > { %p1532_p4 = por %p1804_p1, %p46_p0  ;;  %p193_p7 = scmp.lt.s32.totalorder %s1456_s24, 3 }
   0xf   : > { %p1537_p6 = por %p186_p3, %p46_p0  ;;  %s1458_s30 = smov [#allocation7]  }
  0x10   : > { %s1810_s27 = scalar_select %p1532_p4, 1, 0 }
  0x11   : > { %s1811_s28 = scalar_select %p1537_p6, 1, 0 }
  0x12   : > { %p1542_p8 = pnand %p1057_p5, %p193_p7  ;;  %s205_s7 = sshll.u32 %s1458_s30, 4  ;;  %s206_s7 = int_to_ptr.vmem [resolvable:$true] %s205_s7 }
  0x13   : > { %s1459_s9 = smov [#allocation8]   ;;  %s1283_s11 = scalar_lea.vmem %s206_s7, 3072 }
  0x14   : > { %s1812_s29 = scalar_select %p1542_p8, 1, 0 }
  0x15   : > { %p1210_p9 = pneg %p1542_p8  ;;  %s221_s10 = sshll.u32 %s1459_s9, 4  ;;  %s222_s10 = int_to_ptr.vmem [resolvable:$true] %s221_s10 }
  0x16   : > { %p1284_p13 = scmp.ne.s32.totalorder %s206_s7, %s1283_s11  ;;  %p1291_p5 = scmp.lt.s32.totalorder %s206_s7, %s206_s7 }
  0x17   : > { %p1551_p11 = pnand %p1210_p9, %p1804_p1  ;;  %p1292_p7 = scmp.lt.s32.totalorder %s1283_s11, %s1283_s11 }
  0x19   : > { %p1274_p12 = pneg %p1551_p11  ;;  %p1293_p10 = por %p1292_p7, %p1291_p5 }
  0x1b   : > { %p1286_p0 = pnand %p1284_p13, %p1274_p12 }
  0x1d   : > { %p1287_p3 = pneg %p1286_p0 }
  0x1f   : > { %p1294_p9 = pnand %p1293_p10, %p1287_p3 }
  0x21   : > { %1297 = shalt.err (!%p1294_p9)
}
  0x22   : > { %s1460_s12 = smov 128   ;;  %s1461_s13 = smov 8  }
  0x23   : > { %s1814_s2 = sld [smem:[#allocation17_spill]]  ;;  %s1309_s16 = scalar_lea.vmem %s222_s10, 512 }
  0x24   : > { %p1310_p1 = scmp.ne.s32.totalorder %s222_s10, %s1309_s16  ;;  %p1317_p2 = scmp.lt.s32.totalorder %s222_s10, %s222_s10 }
  0x25   : > { %p1318_p6 = scmp.lt.s32.totalorder %s1309_s16, %s1309_s16 }
  0x26   : > { %p1312_p13 = pnand %p1310_p1, %p1274_p12 }
  0x27   : > { %p1319_p5 = por %p1318_p6, %p1317_p2 }
  0x28   : > { %p1313_p0 = pneg %p1312_p13 }
  0x29   : > { %1213 = dma.hbm_to_vmem [thread:$0]  (!%p1551_p11), %s1814_s2, 3072, %s206_s7, [#allocation6], %s1460_s12, %s1460_s12, %s1461_s13  }
  0x2a   : > { %p1320_p10 = pnand %p1319_p5, %p1313_p0 }
  0x2c   : > { %1323 = shalt.err (!%p1320_p10)
}
  0x2d   : > { %s1815_s4 = sld [smem:[#allocation18_spill]]  ;;  %s1574_s19 = sadd.s32 1, %s1456_s24  }
  0x2e   : > { %s33_s20 = sadd.s32 1, %s1452_s23  ;;  %s30_s26 = ssub.s32 %s1456_s24, %s1574_s19 }
  0x2f   : > { %p40_p1 = scmp.ne.s32.totalorder %s1452_s23, %s1448_s22  ;;  %p31_p2 = scmp.eq.s32.totalorder %s30_s26, 0 }
  0x30   : > { %p41_p6 = scmp.eq.s32.totalorder %s1456_s24, 0  ;;  %p1816_p12 = scmp.eq.s32.totalorder %s1523_s25, 1 }
  0x31   : > { %p1230_p7 = scmp.lt.s32.totalorder %s1456_s24, 2  ;;  %s238_s8 = sand.u32 1, %s1452_s23  }
  0x32   : > { %p1584_p3 = por %p1816_p12, %p40_p1  ;;  %p42_p9 = por %p41_p6, %p40_p1 }
  0x33   : > { %1216 = dma.hbm_to_vmem [thread:$0]  (!%p1551_p11), %s1815_s4, 512, %s222_s10, [#allocation9], %s1460_s12, %s1460_s12, %s1461_s13  }
  0x34   : > { %s1817_s30 = scalar_select %p1584_p3, 1, 0 }
  0x35   : > { %s1590_s7 = scalar_select %p31_p2, %s1452_s23, %s33_s20  }
  0x36   : > { %s1593_s9 = sshll.u32 %s238_s8, 3  ;;  %s1062_s10 = sshll.u32 %s1456_s24, 7 }
  0x37   : > { %1818 = sst [smem:[#allocation16_spill]] %s1590_s7  ;;  %s1599_s13 = scalar_lea.hbm %s1797_s0, %s1062_s10 }
  0x38   : > { %s242_s14 = scalar_lea.vmem [#allocation2], %s1593_s9  ;;  %p1604_p11 = pnand %p1230_p7, %p42_p9 }
  0x39   : > { %s249_s15 = sshll.u32 %s242_s14, 4  ;;  %s1611_s20 = scalar_lea.hbm %s1798_s1, %s1062_s10  ;;  %s1602_s15 = int_to_ptr.vmem [resolvable:$true] %s249_s15 }
  0x3a   : > { %s256_s26 = sand.u32 1, %s1456_s24   ;;  %s239_s11 = scalar_lea.sflag [#allocation3], %s238_s8 }
  0x3b   : > { %s1324_s12 = scalar_lea.hbm %s1599_s13, 128  ;;  %p1326_p0 = pneg %p1604_p11 }
  0x3c   : > { %p1325_p13 = scmp.ne.s32.totalorder %s1599_s13, %s1324_s12  ;;  %s1329_s4 = scalar_lea.hbm %s1797_s0, 256 }
  0x3d   : > { %p1330_p1 = scmp.lt.s32.totalorder %s1599_s13, %s1797_s0  ;;  %p1331_p2 = scmp.lt.s32.totalorder %s1329_s4, %s1324_s12 }
  0x3e   : > { %p1327_p5 = pnand %p1326_p0, %p1325_p13 }
  0x3f   : > { %p1332_p6 = por %p1331_p2, %p1330_p1 }
  0x40   : > { %p1328_p10 = pneg %p1327_p5 }
  0x42   : > { %p1333_p12 = pnand %p1332_p6, %p1328_p10 }
  0x44   : > { %1336 = shalt.err (!%p1333_p12)
}
  0x45   : > { %s1337_s8 = scalar_lea.vmem %s1602_s15, 128  ;;  %s1462_s2 = smov [#allocation2]  }
  0x46   : > { %p1338_p7 = scmp.ne.s32.totalorder %s1602_s15, %s1337_s8  ;;  %s1342_s10 = sshll.u32 %s1462_s2, 4  ;;  %s1343_s10 = int_to_ptr.vmem [resolvable:$false] %s1342_s10 }
  0x47   : > { %s1344_s18 = scalar_lea.vmem %s1343_s10, 256  ;;  %p1345_p5 = scmp.lt.s32.totalorder %s1602_s15, %s1343_s10 }
  0x48   : > { %p1340_p9 = pnand %p1338_p7, %p1326_p0  ;;  %p1346_p3 = scmp.lt.s32.totalorder %s1344_s18, %s1337_s8 }
  0x4a   : > { %p1341_p13 = pneg %p1340_p9  ;;  %p1347_p4 = por %p1346_p3, %p1345_p5 }
  0x4c   : > { %p1348_p1 = pnand %p1347_p4, %p1341_p13 }
  0x4e   : > { %1351 = shalt.err (!%p1348_p1)
}
  0x4f   : > { %1220 = dma.hbm_to_vmem [thread:$0]  (!%p1604_p11), %s1599_s13, 128, %s1602_s15, %s239_s11  }
  0x50   : > { %s260_s4 = scalar_lea.vmem [#allocation5], %s1593_s9  ;;  %s257_s12 = scalar_lea.sflag [#allocation6], %s256_s26 }
  0x51   : > { %s267_s7 = sshll.u32 %s260_s4, 4  ;;  %s1352_s14 = scalar_lea.hbm %s1611_s20, 128  ;;  %s268_s7 = int_to_ptr.vmem [resolvable:$true] %s267_s7 }
  0x52   : > { %p1353_p3 = scmp.ne.s32.totalorder %s1611_s20, %s1352_s14  ;;  %s1357_s2 = scalar_lea.hbm %s1798_s1, 256 }
  0x53   : > { %p1358_p2 = scmp.lt.s32.totalorder %s1611_s20, %s1798_s1  ;;  %p1359_p6 = scmp.lt.s32.totalorder %s1357_s2, %s1352_s14 }
  0x54   : > { %p1355_p4 = pnand %p1353_p3, %p1326_p0 }
  0x55   : > { %p1360_p12 = por %p1359_p6, %p1358_p2 }
  0x56   : > { %p1356_p10 = pneg %p1355_p4 }
  0x58   : > { %p1361_p7 = pnand %p1360_p12, %p1356_p10 }
  0x5a   : > { %1364 = shalt.err (!%p1361_p7)
}
  0x5b   : > { %s1365_s9 = scalar_lea.vmem %s268_s7, 128  ;;  %s1463_s13 = smov [#allocation5]  }
  0x5c   : > { %p1366_p9 = scmp.ne.s32.totalorder %s268_s7, %s1365_s9  ;;  %s1370_s15 = sshll.u32 %s1463_s13, 4  ;;  %s1371_s15 = int_to_ptr.vmem [resolvable:$false] %s1370_s15 }
  0x5d   : > { %s1372_s26 = scalar_lea.vmem %s1371_s15, 256  ;;  %p1373_p1 = scmp.lt.s32.totalorder %s268_s7, %s1371_s15 }
  0x5e   : > { %p1368_p13 = pnand %p1366_p9, %p1326_p0  ;;  %p1374_p3 = scmp.lt.s32.totalorder %s1372_s26, %s1365_s9 }
  0x60   : > { %p1369_p5 = pneg %p1368_p13  ;;  %p1375_p4 = por %p1374_p3, %p1373_p1 }
  0x62   : > { %p1376_p8 = pnand %p1375_p4, %p1369_p5 }
  0x64   : > { %1379 = shalt.err (!%p1376_p8)
}
  0x65   : > { %1223 = dma.hbm_to_vmem [thread:$0]  (!%p1604_p11), %s1611_s20, 128, %s268_s7, %s257_s12  }
  0x66   : > { %p1820_p10 = scmp.ne.s32.totalorder %s1812_s29, 0 }
  0x67   : > { %s1662_s11 = sand.u32 (!%p1820_p10), 1, %s1448_s22   ;;  %p1821_p0 = scmp.ne.s32.totalorder (!%p1820_p10), %s1810_s27, 0 }
  0x68   : > { %276 = sbr.rel (%p1820_p10) target bundleno = 560 (0x230), region = 44  ;;  %s1665_s4 = sshll.u32 (!%p1820_p10), %s1662_s11, 3 }
  0x69   : > { %s279_s14 = scalar_lea.sflag (!%p1820_p10), [#allocation3], %s1662_s11  ;;  %s282_s17 = scalar_lea.vmem (!%p1820_p10), [#allocation2], %s1665_s4 }
  0x6d   : > { %1423 = dma.done.wait (%p1821_p0), %s279_s14, 128  }
  0x6e   : > { %1425 = vsyncadd (%p1821_p0), %s279_s14, 4294967168  ;;  %s287_s29 = sand.u32 1, %s1523_s25   ;;  %s291_s20 = scalar_lea.vmem [#allocation5], %s1665_s4 }
  0x6f   : > { %s288_s16 = scalar_lea.sflag [#allocation6], %s287_s29 }
  0x70   : > { %1427 = dma.done.wait (%p1821_p0), %s288_s16, 128  }
  0x71   : > { %1429 = vsyncadd (%p1821_p0), %s288_s16, 4294967168  ;;  %p1822_p8 = scmp.eq.s32.totalorder %s1523_s25, 0 }
  0x73   : > { %1431 = dma.done.wait (%p1822_p8), [#allocation6], 3072   ;;  %p1823_p11 = pmov %p1822_p8 }
  0x74   : > { %p1824_p2 = pmov %p1822_p8 }
  0x75   : > { %1433 = vsyncadd (%p1823_p11), [#allocation6], 4294964224 }
  0x76   : > { %1435 = dma.done.wait (%p1824_p2), [#allocation9], 512   ;;  %p1825_p6 = pmov %p1824_p2 }
  0x77   : > { %v1464_v0 = vmov 0.0   ;;  %vm1465_vm0 = vmmov 0   ;;  %v335_v1 = vlaneseq  ;;  %v371_v2 = vld [vmem:[#allocation7 + $0x38] sm:$0xff]  ;;  %v370_v4 = vld [vmem:[#allocation7 + $0x30] sm:$0xff]  ;;  %v369_v6 = vld [vmem:[#allocation7 + $0x28] sm:$0xff]  ;;  %vm372_vm1 = vcmask 261120  }
  0x78   : > { %1437 = vsyncadd (%p1825_p6), [#allocation9], 4294966784  ;;  %1119 = vmatprep.subr.mxu0 %v1464_v0  ;;  %1130 = vmatprep.subr.mxu1 %v1464_v0  ;;  %v366_v3 = vld [vmem:[#allocation7 + $0x18] sm:$0xff]  ;;  %v365_v5 = vld [vmem:[#allocation7 + $0x10] sm:$0xff]  ;;  %s1081_s2 = sshll.u32 %s1523_s25, 7  ;;  %s332_s10 = scalar_lea.vmem [#allocation10], %s1665_s4 }
  0x79   : > { %1127 = vmatprep.mubr.msk.f32.mxu0 %vm1465_vm0, %v1464_v0  ;;  %1138 = vmatprep.mubr.msk.f32.mxu1 %vm1465_vm0, %v1464_v0  ;;  %v364_v7 = vld [vmem:[#allocation7 + $0x8] sm:$0xff]  ;;  %v1695_v8 = vshrl.u32 %v335_v1, 7  ;;  %v368_v9 = vld [vmem:[#allocation7 + $0x20] sm:$0xff]  ;;  %v1701_v11 = vld [vmem:[%s291_s20] sm:$0xff]  ;;  %s944_s18 = sshll.u32 %s332_s10, 4  ;;  %s942_s15 = scalar_lea.hbm %s1803_s6, %s1081_s2  ;;  %s945_s18 = int_to_ptr.vmem [resolvable:$true] %s944_s18 }
  0x7a   : > { %1120 = vmatpush3.msra.mxu0 %v371_v2  ;;  %1131 = vmatpush3.msra.mxu1 %v366_v3  ;;  %v363_v10 = vld [vmem:[#allocation7] sm:$0xff]  ;;  %v523_v13 = vld [vmem:[#allocation7 + $0x58] sm:$0xff]  ;;  %v522_v16 = vld [vmem:[#allocation7 + $0x50] sm:$0xff]  ;;  %v355_v21 = vrot.slane %v1701_v11, 7  ;;  %v361_v30 = vrot.slane %v1701_v11, 1  ;;  %s931_s26 = scalar_lea.sflag [#allocation4], %s1662_s11 }
  0x7b   : > { %1121 = vmatprep.subr.mxu0 %v1464_v0  ;;  %1132 = vmatprep.subr.mxu1 %v1464_v0  ;;  %v1707_v12 = vld [vmem:[%s282_s17] sm:$0xff]  ;;  %v602_v14 = vld [vmem:[#allocation7 + $0x78] sm:$0xff]  ;;  %v341_v15 = vand.u32 7, %v1695_v8  ;;  %v601_v17 = vld [vmem:[#allocation7 + $0x70] sm:$0xff]  ;;  %s1380_s14 = scalar_lea.vmem %s945_s18, 128  ;;  %p1826_p7 = scmp.ne.s32.totalorder %s1817_s30, 0 }
  0x7c   : > { %1122 = vmatpush3.msra.mxu0 %v370_v4  ;;  %1133 = vmatpush3.msra.mxu1 %v365_v5  ;;  %v351_v18 = vrot.slane %v1707_v12, 7  ;;  %v521_v19 = vld [vmem:[#allocation7 + $0x48] sm:$0xff]  ;;  %v520_v22 = vld [vmem:[#allocation7 + $0x40] sm:$0xff]  ;;  %v681_v26 = vld [vmem:[#allocation7 + $0x98] sm:$0xff]  ;;  %v357_v31 = vrot.slane %v1707_v12, 1  ;;  %p1381_p12 = scmp.ne.s32.totalorder %s945_s18, %s1380_s14  ;;  %s1466_s25 = smov [#allocation10]  }
  0x7d   : > { %1123 = vmatprep.subr.mxu0 %v1464_v0  ;;  %1134 = vmatprep.subr.mxu1 %v1464_v0  ;;  %v600_v20 = vld [vmem:[#allocation7 + $0x68] sm:$0xff]  ;;  %vm349_vm2 = vcmp.ne.s32.totalorder %v341_v15, 0  ;;  %v599_v23 = vld [vmem:[#allocation7 + $0x60] sm:$0xff]  ;;  %v760_v27 = vld [vmem:[#allocation7 + $0xb8] sm:$0xff]  ;;  %vm350_vm3 = vcmp.ne.s32.totalorder %v341_v15, 7  ;;  %s1384_s4 = sshll.u32 %s1466_s25, 4  ;;  %s1385_s4 = int_to_ptr.vmem [resolvable:$false] %s1384_s4 }
  0x7e   : > { %1124 = vmatpush3.msra.mxu0 %v369_v6  ;;  %1135 = vmatpush3.msra.mxu1 %v364_v7  ;;  %v354_v24 = vsel %vm349_vm2, %v351_v18, 0.0  ;;  %v356_v25 = vsel %vm349_vm2, %v355_v21, 0.0  ;;  %v680_v28 = vld [vmem:[#allocation7 + $0x90] sm:$0xff]  ;;  %v679_v32 = vld [vmem:[#allocation7 + $0x88] sm:$0xff]  ;;  %v678_v34 = vld [vmem:[#allocation7 + $0x80] sm:$0xff]  ;;  %v360_v36 = vsel %vm350_vm3, %v357_v31, 0.0  ;;  %p1382_p9 = pnand %p1381_p12, %p1826_p7  ;;  %p1387_p5 = scmp.lt.s32.totalorder %s945_s18, %s1385_s4 }
  0x7f   : > { %1125 = vmatprep.subr.mxu0 %v1464_v0  ;;  %1136 = vmatprep.subr.mxu1 %v1464_v0  ;;  %v759_v29 = vld [vmem:[#allocation7 + $0xb0] sm:$0xff]  ;;  %v758_v33 = vld [vmem:[#allocation7 + $0xa8] sm:$0xff]  ;;  %v757_v35 = vld [vmem:[#allocation7 + $0xa0] sm:$0xff]  ;;  %v362_v37 = vsel %vm350_vm3, %v361_v30, 0.0  ;;  %s1386_s17 = scalar_lea.vmem %s1385_s4, 256 }
  0x80   : > { %1126 = vmatpush3.msra.mxu0 %v368_v9  ;;  %1137 = vmatpush3.msra.mxu1 %v363_v10  ;;  %v847_v38 = vld [vmem:[#allocation8 + $0x18] sm:$0xff]  ;;  %v846_v39 = vld [vmem:[#allocation8 + $0x10] sm:$0xff]  ;;  %v845_v40 = vld [vmem:[#allocation8 + $0x8] sm:$0xff]  ;;  %p1383_p13 = pneg %p1382_p9  ;;  %p1388_p1 = scmp.lt.s32.totalorder %s1386_s17, %s1380_s14 }
  0x81   : > { %1128 = vmatmul.mubr.msk.f32.vlgmr.msra.gmra.mxu0 %vm372_vm1, %v1701_v11  ;;  %1141 = vmatprep.subr.mxu0 %v1464_v0  ;;  %v844_v41 = vld [vmem:[#allocation8] sm:$0xff] }
  0x82   : > { %1152 = vmatprep.subr.mxu1 %v1464_v0  ;;  %1139 = vmatmul.mubr.msk.f32.vlgmr.msra.gmra.mxu1 %vm372_vm1, %v1707_v12  ;;  %v1077_v56 = vld [vmem:[%s1800_s3] ss:$0 sm:$0xff]  ;;  %p1389_p3 = por %p1388_p1, %p1387_p5 }
  0x83   : > { %1142 = vmatpush3.msra.mxu0 %v523_v13  ;;  %1153 = vmatpush3.msra.mxu1 %v602_v14  ;;  %v1078_v62 = vld [vmem:[%s1802_s5] ss:$0 sm:$0xff] }
  0x84   : > { %1143 = vmatprep.subr.mxu0 %v1464_v0  ;;  %1154 = vmatprep.subr.mxu1 %v1464_v0  ;;  %p1390_p4 = pnand %p1389_p3, %p1383_p13 }
  0x85   : > { %1144 = vmatpush3.msra.mxu0 %v522_v16  ;;  %1155 = vmatpush3.msra.mxu1 %v601_v17 }
  0x86   : > { %1145 = vmatprep.subr.mxu0 %v1464_v0  ;;  %1156 = vmatprep.subr.mxu1 %v1464_v0 }
  0x87   : > { %1146 = vmatpush3.msra.mxu0 %v521_v19  ;;  %1157 = vmatpush3.msra.mxu1 %v600_v20 }
  0x88   : > { %1147 = vmatprep.subr.mxu0 %v1464_v0  ;;  %1158 = vmatprep.subr.mxu1 %v1464_v0 }
  0x89   : > { %1148 = vmatpush3.msra.mxu0 %v520_v22  ;;  %1149 = vmatprep.mubr.msk.f32.mxu0 %vm1465_vm0, %v1464_v0 }
  0x8a   : > { %1159 = vmatpush3.msra.mxu1 %v599_v23  ;;  %1150 = vmatmul.mubr.msk.f32.vlgmr.msra.gmra.mxu0 %vm372_vm1, %v354_v24 }
  0x8b   : > { %1160 = vmatprep.mubr.msk.f32.mxu1 %vm1465_vm0, %v1464_v0  ;;  %1163 = vmatprep.subr.mxu0 %v1464_v0 }
  0x8c   : > { %1174 = vmatprep.subr.mxu1 %v1464_v0  ;;  %1161 = vmatmul.mubr.msk.f32.vlgmr.msra.gmra.mxu1 %vm372_vm1, %v356_v25 }
  0x8d   : > { %1164 = vmatpush3.msra.mxu0 %v681_v26  ;;  %1175 = vmatpush3.msra.mxu1 %v760_v27 }
  0x8e   : > { %1165 = vmatprep.subr.mxu0 %v1464_v0  ;;  %1176 = vmatprep.subr.mxu1 %v1464_v0 }
  0x8f   : > { %1166 = vmatpush3.msra.mxu0 %v680_v28  ;;  %1177 = vmatpush3.msra.mxu1 %v759_v29 }
  0x90   : > { %1167 = vmatprep.subr.mxu0 %v1464_v0  ;;  %1178 = vmatprep.subr.mxu1 %v1464_v0 }
  0x91   : > { %1168 = vmatpush3.msra.mxu0 %v679_v32  ;;  %1179 = vmatpush3.msra.mxu1 %v758_v33 }
  0x92   : > { %1169 = vmatprep.subr.mxu0 %v1464_v0  ;;  %1180 = vmatprep.subr.mxu1 %v1464_v0 }
  0x93   : > { %1170 = vmatpush3.msra.mxu0 %v678_v34  ;;  %1171 = vmatprep.mubr.msk.f32.mxu0 %vm1465_vm0, %v1464_v0 }
  0x94   : > { %1181 = vmatpush3.msra.mxu1 %v757_v35  ;;  %1182 = vmatprep.mubr.msk.f32.mxu1 %vm1465_vm0, %v1464_v0 }
  0x95   : > { %1172 = vmatmul.mubr.msk.f32.vlgmr.msra.gmra.mxu0 %vm372_vm1, %v360_v36  ;;  %1183 = vmatmul.mubr.msk.f32.vlgmr.msra.gmra.mxu1 %vm372_vm1, %v362_v37 }
  0x96   : > { %1185 = vmatprep.subr.mxu0 %v1464_v0  ;;  %1193 = vmatprep.mubr.msk.f32.mxu0 %vm1465_vm0, %v1464_v0 }
  0x97   : > { %1186 = vmatpush3.msra.mxu0 %v847_v38 }
  0x98   : > { %1187 = vmatprep.subr.mxu0 %v1464_v0 }
  0x99   : > { %1188 = vmatpush3.msra.mxu0 %v846_v39 }
  0x9a   : > { %1189 = vmatprep.subr.mxu0 %v1464_v0 }
  0x9b   : > { %1190 = vmatpush3.msra.mxu0 %v845_v40 }
  0x9c   : > { %1191 = vmatprep.subr.mxu0 %v1464_v0 }
  0x9d   : > { %1192 = vmatpush3.msra.mxu0 %v844_v41 }
 0x141   : > { %v442_v42 = vpop.f32.mrf.mxu0 }
 0x142   : > { %v515_v43 = vpop.f32.mrf.mxu1 }
 0x143   : > { %v1129_v44 = vpop.f32.mrf.mxu0  ;;  %v516_v49 = vadd.f32 %v515_v43, %v442_v42 }
 0x144   : > { %v1140_v45 = vpop.f32.mrf.mxu1 }
 0x14a   : > { %v593_v46 = vpop.f32.mrf.mxu0 }
 0x14b   : > { %v597_v51 = vadd.f32 %v593_v46, %v516_v49 }
 0x14c   : > { %v672_v47 = vpop.f32.mrf.mxu1  ;;  %v1151_v48 = vpop.f32.mrf.mxu0 }
 0x14d   : > { %v676_v52 = vadd.f32 %v672_v47, %v597_v51 }
 0x14e   : > { %v1162_v50 = vpop.f32.mrf.mxu1 }
 0x155   : > { %v751_v53 = vpop.f32.mrf.mxu0  ;;  %v830_v54 = vpop.f32.mrf.mxu1 }
 0x156   : > { %v755_v55 = vadd.f32 %v751_v53, %v676_v52 }
 0x157   : > { %v1173_v57 = vpop.f32.mrf.mxu0  ;;  %v1184_v58 = vpop.f32.mrf.mxu1 }
 0x158   : > { %v834_v59 = vadd.f32 %v830_v54, %v755_v55 }
 0x15a   : > { %v842_v60 = vadd.f32 %v1077_v56, %v834_v59 }
 0x15c   : > { %v843_v61 = vmax.f32 %v842_v60, 0.0 }
 0x15e   : > { %1194 = vmatmul.mubr.msk.f32.vlgmr.msra.gmra.mxu0 %vm372_vm1, %v843_v61 }
 0x21e   : > { %v924_v63 = vpop.f32.mrf.mxu0 }
 0x21f   : > { %v925_v0 = vadd.f32 %v1078_v62, %v924_v63 }
 0x220   : > { %v1195_v1 = vpop.f32.mrf.mxu0 }
 0x221   : > { %v928_v2 = vadd.f32 %v925_v0, %v1701_v11 }
 0x223   : > { %929 = vst.msk [vmem:[%s332_s10] sm:$0xff] %vm372_vm1, %v928_v2 }
 0x224   : > { %1393 = shalt.err (!%p1390_p4)
}
 0x225   : > { %s1394_s29 = scalar_lea.hbm %s942_s15, 128  ;;  %s1398_s20 = scalar_lea.hbm %s1803_s6, 256 }
 0x226   : > { %p1395_p10 = scmp.ne.s32.totalorder %s942_s15, %s1394_s29  ;;  %p1399_p11 = scmp.lt.s32.totalorder %s942_s15, %s1803_s6 }
 0x227   : > { %p1400_p2 = scmp.lt.s32.totalorder %s1398_s20, %s1394_s29 }
 0x228   : > { %p1396_p0 = pnand %p1395_p10, %p1826_p7 }
 0x229   : > { %p1401_p6 = por %p1400_p2, %p1399_p11 }
 0x22a   : > { %p1397_p8 = pneg %p1396_p0 }
 0x22c   : > { %p1402_p12 = pnand %p1401_p6, %p1397_p8 }
 0x22e   : > { %1405 = shalt.err (!%p1402_p12)
}
 0x22f   : > { %1208 = dma.vmem_to_hbm [thread:$0]  (%p1826_p7), %s945_s18, 128, %s942_s15, %s931_s26  }
 0x230 PF: > { %s956_s12 = sand.u32 1, %s1444_s21   ;;  %p1827_p9 = scmp.ne.s32.totalorder %s1811_s28, 0 }
 0x231   : > { %p1828_p13 = scmp.ge.s32.totalorder %s1456_s24, 2  ;;  %s957_s8 = scalar_lea.sflag [#allocation4], %s956_s12 }
 0x233   : > { %p1225_p5 = pnand %p1828_p13, %p1827_p9 }
 0x235   : > { %p1226_p1 = pneg %p1225_p5 }
 0x237   : > { %1439 = dma.done.wait (%p1226_p1), %s957_s8, 128  }
 0x238   : > { %1441 = vsyncadd (%p1226_p1), %s957_s8, 4294967168  ;;  %s1829_s2 = sld [smem:[#allocation16_spill]]  ;;  %p23_p3 = scmp.ge.s32.totalorder %s1574_s19, 4  }
 0x239   : > { %s1830_s21 = smov %s1448_s22  ;;  %s1831_s22 = smov %s1452_s23 }
 0x23a   : > { %s1833_s24 = smov %s1574_s19  ;;  %25 = sbr.rel (!%p23_p3) target bundleno = 11 (0xb), region = 115 }
 0x23e   : > { %s1832_s23 = smov %s1829_s2 }
 0x23f   :  { %962 = vsyncpa [#allocation3], 1 }
 0x240   :  { %964 = vsyncpa [#allocation3 + $0x1], 1 }
 0x241   :  { %965 = vsyncpa [#allocation6], 1 }
 0x242   :  { %967 = vsyncpa [#allocation6 + $0x1], 1 }
 0x243   :  { %968 = vsyncpa [#allocation9], 1 }
 0x244   :  { %969 = vsyncpa [#allocation4], 1 }
 0x245   :  { %971 = vsyncpa [#allocation4 + $0x1], 1 }

</bundles_post_ra>
